<compile_context>
chip_gen: v5e
topology: v5e:2x2
jax: 0.10.0
libtpu: 0.0.40
codegen_flags: <defaults>
</compile_context>

<pallas_src>
import jax
import jax.numpy as jnp
from jax import lax
from jax.experimental import pallas as pl
from jax.experimental.pallas import tpu as pltpu


def _round_up(x, m):
    return (x + m - 1) // m * m


def _choose_tile_m(M, cap):
    """Largest legal row tile <= cap, preferring exact divisors of M (no pad)."""
    cap = max(8, int(cap))
    if M <= cap:
        return M, M                        # single full-extent block (always legal)
    for align in (128, 8):
        d = (min(cap, M) // align) * align
        while d >= align:
            if M % d == 0:
                return d, M                # exact divisor -> no pad/slice HBM pass
            d -= align
    tm = max(8, (cap // 8) * 8)            # fallback: pad M (rare, odd shapes)
    return tm, _round_up(M, tm)


def _tubelet_proj_kernel(p_ref, w_ref, b_ref, o_ref):
    # p_ref: (tm, K) patch rows; w_ref: (K, E); b_ref: (1, E) f32; o_ref: (tm, E)
    acc = jnp.dot(p_ref[...], w_ref[...], preferred_element_type=jnp.float32)
    o_ref[...] = (acc + b_ref[...]).astype(o_ref.dtype)


def tubelet_embedding(videos, weight, bias, patch_size, *, tile_m=8192,
                      compute_dtype=None, out_dtype=None,
                      vmem_budget_bytes=40 * 1024 * 1024):
    """videos: (B, 1, T, H, W); weight: (E, 1, p, p, p); bias: (E,).

    Returns (B, N, E) with N = (T//p)*(H//p)*(W//p), matching PyTorch's
    projection(videos).view(B, C, -1).permute(0, 2, 1).
    """
    p = patch_size
    B, C_in, T, H, W = videos.shape
    assert C_in == 1, "TubeletEmbedding is defined for in_channels=1"
    E = weight.shape[0]
    Tn, Hn, Wn = T // p, H // p, W // p
    N = Tn * Hn * Wn
    K = p * p * p
    M = B * N

    if out_dtype is None:
        out_dtype = videos.dtype

    # --- patchify (pure relayout; candidate for fusion into the input DMA) ---
    x = videos.reshape(B, Tn, p, Hn, p, Wn, p)
    x = x.transpose(0, 1, 3, 5, 2, 4, 6)            # (B, Tn, Hn, Wn, p, p, p)
    patches = x.reshape(M, K)                       # rows=(b,tn,hn,wn), cols=(dt,dh,dw)

    # Flattened conv weight: (E, 1, p, p, p) -> (K, E); same (kT,kH,kW) order.
    w_flat = jnp.transpose(weight.reshape(E, K))    # (K, E)
    b_row = bias.reshape(1, E).astype(jnp.float32)  # bias add stays f32

    if compute_dtype is not None:
        patches = patches.astype(compute_dtype)
        w_flat = w_flat.astype(compute_dtype)

    # --- tile selection against a (v7x-safe) VMEM budget -----------------
    in_sz = jnp.dtype(patches.dtype).itemsize
    out_sz = jnp.dtype(out_dtype).itemsize
    w_bytes = K * E * in_sz                 # single-buffered (Buffered(1))
    b_bytes = E * 4
    per_row = 2 * K * in_sz + 2 * E * out_sz        # double-buffered in/out rows
    budget = max(int(vmem_budget_bytes) - w_bytes - b_bytes, 128 * per_row)
    cap = min(int(tile_m), max(budget // per_row, 8))
    if M >= 256:
        # keep at least 2 blocks so the "parallel" axis feeds both TCs (v7x)
        cap = min(cap, max(128, (M // 2) // 128 * 128))
    tm, M_pad = _choose_tile_m(M, cap)
    if M_pad != M:
        patches = jnp.pad(patches, ((0, M_pad - M), (0, 0)))

    vmem_need = w_bytes + b_bytes + 2 * tm * K * in_sz + 2 * tm * E * out_sz
    vmem_limit = int(min(max(vmem_need + (8 << 20), 32 << 20), 96 << 20))

    grid = (M_pad // tm,)

    out = pl.pallas_call(
        _tubelet_proj_kernel,
        out_shape=jax.ShapeDtypeStruct((M_pad, E), out_dtype),
        grid_spec=pltpu.PrefetchScalarGridSpec(
            num_scalar_prefetch=0,
            grid=grid,
            in_specs=[
                pl.BlockSpec((tm, K), lambda i: (i, 0)),            # patch rows
                pl.BlockSpec((K, E), lambda i: (0, 0),              # weight: resident,
                             pipeline_mode=pl.Buffered(1)),         #   single-buffered
                pl.BlockSpec((1, E), lambda i: (0, 0),              # bias: resident
                             pipeline_mode=pl.Buffered(1)),
            ],
            out_specs=pl.BlockSpec((tm, E), lambda i: (i, 0)),
        ),
        compiler_params=pltpu.CompilerParams(
            dimension_semantics=("parallel",),
            vmem_limit_bytes=vmem_limit,
            # Let XLA fuse the patchify relayout / dtype cast into the patches
            # operand DMA instead of materializing it in HBM.
            allow_input_fusion=[True, False, False],
        ),
    )(patches, w_flat, b_row)

    if M_pad != M:
        out = out[:M]
    return out.reshape(B, N, E)   # free view when M_pad == M (common case)


def _reference(videos, weight, bias, patch_size):
    # Pure-JAX reference: real 3D conv (cross-correlation, like PyTorch) + bias.
    p = patch_size
    out = lax.conv_general_dilated(
        videos, weight,
        window_strides=(p, p, p),
        padding="VALID",
        dimension_numbers=("NCDHW", "OIDHW", "NCDHW"),
        precision=lax.Precision.HIGHEST,
    )                                              # (B, E, T', H', W')
    out = out + bias[None, :, None, None, None]
    B, E = out.shape[0], out.shape[1]
    out = out.reshape(B, E, -1)                    # (B, E, N)
    return jnp.transpose(out, (0, 2, 1))           # (B, N, E)


if __name__ == "__main__":
    key = jax.random.PRNGKey(0)
    k1, k2, k3, k4 = jax.random.split(key, 4)

    # Small shapes consistent with the module.
    embed_dim = 32
    patch_size = 4
    B, T, H, W = 2, 8, 16, 16

    videos = jax.random.normal(k1, (B, 1, T, H, W), dtype=jnp.float32)
    weight = 0.05 * jax.random.normal(
        k2, (embed_dim, 1, patch_size, patch_size, patch_size), dtype=jnp.float32)
    bias = 0.05 * jax.random.normal(k3, (embed_dim,), dtype=jnp.float32)

    N = (T // patch_size) * (H // patch_size) * (W // patch_size)
    ref = _reference(videos, weight, bias, patch_size)

    # f32 data path.
    run_f32 = jax.jit(lambda v, w, b: tubelet_embedding(v, w, b, patch_size))
    out = jax.block_until_ready(run_f32(videos, weight, bias))
    assert out.shape == ref.shape == (B, N, embed_dim)
    assert jnp.allclose(out, ref, atol=5e-3, rtol=5e-3), \
        float(jnp.max(jnp.abs(out - ref)))

    # bf16 data path (f32 MXU accumulation), looser tolerance.
    run_bf16 = jax.jit(lambda v, w, b: tubelet_embedding(
        v, w, b, patch_size, compute_dtype=jnp.bfloat16))
    out_bf16 = jax.block_until_ready(run_bf16(videos, weight, bias))
    assert jnp.allclose(out_bf16.astype(jnp.float32), ref, atol=5e-2, rtol=5e-2)

    # Larger spatial case forcing a multi-block "parallel" grid (M=256, tm=128).
    videos2 = jax.random.normal(k4, (B, 1, T, 32, 32), dtype=jnp.float32)
    ref2 = _reference(videos2, weight, bias, patch_size)
    run_2 = jax.jit(lambda v, w, b: tubelet_embedding(v, w, b, patch_size,
                                                      tile_m=128))
    out2 = jax.block_until_ready(run_2(videos2, weight, bias))
    assert out2.shape == ref2.shape
    assert jnp.allclose(out2, ref2, atol=5e-3, rtol=5e-3), \
        float(jnp.max(jnp.abs(out2 - ref2)))

    print("KERNEL_OK")
</pallas_src>

<mosaic_0001>
module attributes {stable_mosaic.version = 11 : i64} {
  func.func @_tubelet_proj_kernel(%arg0: i32, %arg1: memref<64x64xf32, #tpu.memory_space<vmem>>, %arg2: memref<64x32xf32, #tpu.memory_space<vmem>>, %arg3: memref<1x32xf32, #tpu.memory_space<vmem>>, %arg4: memref<64x32xf32, #tpu.memory_space<vmem>>) attributes {dimension_semantics = [#tpu.dimension_semantics<parallel>], iteration_bounds = array<i64: 1>, scalar_prefetch = 0 : i64, scratch_operands = 0 : i64, tpu.core_type = #tpu.core_type<tc>, window_params = [{transform_indices = @transform_0, window_bounds = array<i64: 64, 64>}, {pipeline_mode = #tpu.pipeline_mode<synchronous>, transform_indices = @transform_1, window_bounds = array<i64: 64, 32>}, {pipeline_mode = #tpu.pipeline_mode<synchronous>, transform_indices = @transform_2, window_bounds = array<i64: 1, 32>}, {transform_indices = @transform_3, window_bounds = array<i64: 64, 32>}]} {
    %c0 = arith.constant 0 : index
    %c0_0 = arith.constant 0 : index
    %0 = vector.load %arg1[%c0, %c0_0] : memref<64x64xf32, #tpu.memory_space<vmem>>, vector<64x64xf32>
    %c0_1 = arith.constant 0 : index
    %c0_2 = arith.constant 0 : index
    %1 = vector.load %arg2[%c0_1, %c0_2] : memref<64x32xf32, #tpu.memory_space<vmem>>, vector<64x32xf32>
    %cst = arith.constant dense<0.000000e+00> : vector<64x32xf32>
    %2 = tpu.matmul %0, %1, %cst {dimension_numbers = #tpu.dot_dimension_numbers<[1], [0], [0], [1], [0, 0, 1, 1], [], []>} : vector<64x64xf32>, vector<64x32xf32>, vector<64x32xf32> -> vector<64x32xf32>
    %c0_3 = arith.constant 0 : index
    %c0_4 = arith.constant 0 : index
    %3 = vector.load %arg3[%c0_3, %c0_4] : memref<1x32xf32, #tpu.memory_space<vmem>>, vector<1x32xf32>
    %4 = vector.broadcast %3 : vector<1x32xf32> to vector<64x32xf32>
    %5 = arith.addf %2, %4 : vector<64x32xf32>
    %c0_5 = arith.constant 0 : index
    %c0_6 = arith.constant 0 : index
    %6 = vector.load %arg4[%c0_5, %c0_6] : memref<64x32xf32, #tpu.memory_space<vmem>>, vector<64x32xf32>
    tpu.vector_store %arg4[%c0_5, %c0_6], %5 {strides = array<i32>} : memref<64x32xf32, #tpu.memory_space<vmem>>, vector<64x32xf32>,
    return
  }
  func.func @transform_0(%arg0: i32) -> (i32, i32) {
    %c0_i32 = arith.constant 0 : i32
    %c0_i32_0 = arith.constant 0 : i32
    return %arg0, %c0_i32 : i32, i32
  }
  func.func @transform_1(%arg0: i32) -> (i32, i32) {
    %c0_i32 = arith.constant 0 : i32
    %c0_i32_0 = arith.constant 0 : i32
    %c0_i32_1 = arith.constant 0 : i32
    return %c0_i32, %c0_i32_0 : i32, i32
  }
  func.func @transform_2(%arg0: i32) -> (i32, i32) {
    %c0_i32 = arith.constant 0 : i32
    %c0_i32_0 = arith.constant 0 : i32
    %c0_i32_1 = arith.constant 0 : i32
    return %c0_i32, %c0_i32_0 : i32, i32
  }
  func.func @transform_3(%arg0: i32) -> (i32, i32) {
    %c0_i32 = arith.constant 0 : i32
    %c0_i32_0 = arith.constant 0 : i32
    return %arg0, %c0_i32 : i32, i32
  }
}

</mosaic_0001>

<bundles_post_ra>
// kernel: _lambda_.1
= control target key start
LH: loop header
LB: loop body
LE: loop exit
PB: predicated region body
PF: predicated region fallthrough
CT: control target
= control target key end

     0   :  { %s283_s0 = inlined_call_operand.vmem [shape: f32[64,64], index: 0, kind: input, shape index: {}]   ;;  %s284_s1 = inlined_call_operand.vmem [shape: f32[64,32], index: 1, kind: input, shape index: {}]   ;;  %s285_s2 = inlined_call_operand.vmem [shape: f32[1,32], index: 2, kind: input, shape index: {}]   ;;  %s286_s3 = inlined_call_operand.hbm [shape: f32[64,32], index: 3, kind: output, shape index: {}]  }
   0x1   :  { %v30_v0 = vld [vmem:[%s284_s1 + $0x38] sm:$0xff]  ;;  %v29_v1 = vld [vmem:[%s284_s1 + $0x30] sm:$0xff]  ;;  %v28_v2 = vld [vmem:[%s284_s1 + $0x28] sm:$0xff] }
   0x2   :  { %137 = vmatpush.msra.mxu2 %v30_v0  ;;  %138 = vmatpush.msra.mxu3 %v30_v0  ;;  %v27_v3 = vld [vmem:[%s284_s1 + $0x20] sm:$0xff]  ;;  %v26_v4 = vld [vmem:[%s284_s1 + $0x18] sm:$0xff] }
   0x3   :  { %68 = vmatpush.msra.mxu0 %v30_v0  ;;  %136 = vmatpush.msra.mxu1 %v30_v0 }
   0x4   :  { %140 = vmatpush.msra.mxu2 %v29_v1  ;;  %141 = vmatpush.msra.mxu3 %v29_v1 }
   0x5   :  { %69 = vmatpush.msra.mxu0 %v29_v1  ;;  %139 = vmatpush.msra.mxu1 %v29_v1 }
   0x6   :  { %143 = vmatpush.msra.mxu2 %v28_v2  ;;  %144 = vmatpush.msra.mxu3 %v28_v2 }
   0x7   :  { %70 = vmatpush.msra.mxu0 %v28_v2  ;;  %142 = vmatpush.msra.mxu1 %v28_v2 }
   0x8   :  { %8 = vsyncpa [#allocation3], 0  ;;  %146 = vmatpush.msra.mxu2 %v27_v3  ;;  %147 = vmatpush.msra.mxu3 %v27_v3  ;;  %v25_v5 = vld [vmem:[%s284_s1 + $0x10] sm:$0xff]  ;;  %v24_v6 = vld [vmem:[%s284_s1 + $0x8] sm:$0xff]  ;;  %vm35_vm0 = vcmask 523264   ;;  %vm101_vm1 = vcmask 261120  }
   0x9   :  { %71 = vmatpush.msra.mxu0 %v27_v3  ;;  %145 = vmatpush.msra.mxu1 %v27_v3  ;;  %v23_v7 = vld [vmem:[%s284_s1] sm:$0xff]  ;;  %v21_v9 = vld [vmem:[%s283_s0 + $0x30] sm:$0xff]  ;;  %v20_v12 = vld [vmem:[%s283_s0 + $0x28] sm:$0xff]  ;;  %s116_s20 = sshll.u32 %s286_s3, 4  ;;  %s191_s21 = smov 128   ;;  %s117_s20 = int_to_ptr.hbm [resolvable:$true] %s116_s20 }
   0xa   :  { %149 = vmatpush.msra.mxu2 %v26_v4  ;;  %150 = vmatpush.msra.mxu3 %v26_v4  ;;  %v19_v8 = vld [vmem:[%s283_s0 + $0x20] sm:$0xff]  ;;  %v17_v11 = vld [vmem:[%s283_s0 + $0x10] sm:$0xff]  ;;  %v22_v13 = vld [vmem:[%s283_s0 + $0x38] sm:$0xff]  ;;  %s192_s22 = smov 8  }
   0xb   :  { %72 = vmatpush.msra.mxu0 %v26_v4  ;;  %148 = vmatpush.msra.mxu1 %v26_v4  ;;  %v15_v10 = vld [vmem:[%s283_s0] sm:$0xff]  ;;  %v16_v14 = vld [vmem:[%s283_s0 + $0x8] sm:$0xff]  ;;  %v18_v15 = vld [vmem:[%s283_s0 + $0x18] sm:$0xff]  ;;  %s190_s0 = smov [#allocation2]  }
   0xc   :  { %152 = vmatpush.msra.mxu2 %v25_v5  ;;  %153 = vmatpush.msra.mxu3 %v25_v5  ;;  %v163_v16 = vld [vmem:[%s285_s2] ss:$0 sm:$0xff]  ;;  %s114_s2 = sshll.u32 %s190_s0, 4  ;;  %s115_s2 = int_to_ptr.vmem [resolvable:$true] %s114_s2 }
   0xd   :  { %73 = vmatpush.msra.mxu0 %v25_v5  ;;  %151 = vmatpush.msra.mxu1 %v25_v5 }
   0xe   :  { %155 = vmatpush.msra.mxu2 %v24_v6  ;;  %156 = vmatpush.msra.mxu3 %v24_v6 }
   0xf   :  { %74 = vmatpush.msra.mxu0 %v24_v6  ;;  %154 = vmatpush.msra.mxu1 %v24_v6 }
  0x10   :  { %158 = vmatpush.msra.mxu2 %v23_v7  ;;  %159 = vmatpush.msra.mxu3 %v23_v7 }
  0x11   :  { %132 = vmatmul.msk.f32.vlgmr.msra.gmra.mxu2 %vm35_vm0, %v19_v8  ;;  %134 = vmatmul.msk.f32.vlgmr.msra.gmra.mxu3 %vm35_vm0, %v21_v9 }
  0x12   :  { %75 = vmatpush.msra.mxu0 %v23_v7  ;;  %157 = vmatpush.msra.mxu1 %v23_v7 }
  0x13   :  { %128 = vmatmul.msk.f32.vlgmr.msra.gmra.mxu0 %vm35_vm0, %v15_v10  ;;  %130 = vmatmul.msk.f32.vlgmr.msra.gmra.mxu1 %vm35_vm0, %v17_v11 }
  0x19   :  { %133 = vmatmul.msk.f32.gmra.mxu2 %vm35_vm0, %v20_v12  ;;  %135 = vmatmul.msk.f32.gmra.mxu3 %vm35_vm0, %v22_v13 }
  0x1b   :  { %129 = vmatmul.msk.f32.gmra.mxu0 %vm35_vm0, %v16_v14  ;;  %131 = vmatmul.msk.f32.gmra.mxu1 %vm35_vm0, %v18_v15 }
  0x90   :  { %v77_v17 = vpop.f32.mrf.mxu0  ;;  %v83_v18 = vpop.f32.mrf.mxu1 }
  0x91   :  { %v78_v19 = vadd.f32 %v163_v16, %v77_v17  ;;  %v84_v20 = vadd.f32 %v163_v16, %v83_v18 }
  0x93   :  { %102 = vst.msk [vmem:[#allocation2] sm:$0xff] %vm101_vm1, %v78_v19 }
  0x94   :  { %104 = vst.msk [vmem:[#allocation2 + $0x10] sm:$0xff] %vm101_vm1, %v84_v20  ;;  %v89_v21 = vpop.f32.mrf.mxu2  ;;  %v95_v22 = vpop.f32.mrf.mxu3 }
  0x95   :  { %v90_v23 = vadd.f32 %v163_v16, %v89_v21  ;;  %v96_v24 = vadd.f32 %v163_v16, %v95_v22 }
  0x97   :  { %106 = vst.msk [vmem:[#allocation2 + $0x20] sm:$0xff] %vm101_vm1, %v90_v23 }
  0x98   :  { %108 = vst.msk [vmem:[#allocation2 + $0x30] sm:$0xff] %vm101_vm1, %v96_v24  ;;  %v80_v25 = vpop.f32.mrf.mxu0  ;;  %v86_v26 = vpop.f32.mrf.mxu1 }
  0x99   :  { %v81_v27 = vadd.f32 %v163_v16, %v80_v25  ;;  %v87_v28 = vadd.f32 %v163_v16, %v86_v26 }
  0x9b   :  { %103 = vst.msk [vmem:[#allocation2 + $0x8] sm:$0xff] %vm101_vm1, %v81_v27 }
  0x9c   :  { %105 = vst.msk [vmem:[#allocation2 + $0x18] sm:$0xff] %vm101_vm1, %v87_v28  ;;  %v92_v29 = vpop.f32.mrf.mxu2  ;;  %v98_v30 = vpop.f32.mrf.mxu3 }
  0x9d   :  { %v93_v31 = vadd.f32 %v163_v16, %v92_v29  ;;  %v99_v32 = vadd.f32 %v163_v16, %v98_v30 }
  0x9f   :  { %107 = vst.msk [vmem:[#allocation2 + $0x28] sm:$0xff] %vm101_vm1, %v93_v31 }
  0xa0   :  { %109 = vst.msk [vmem:[#allocation2 + $0x38] sm:$0xff] %vm101_vm1, %v99_v32 }
  0xa1   :  { %122 = dma.vmem_to_hbm [thread:$0]  %s115_s2, 1024, %s117_s20, [#allocation3], %s191_s21, %s191_s21, %s192_s22  }
  0xa2   :  { %188 = dma.done.wait [#allocation3], 1024  }
  0xa3   :  { %189 = vsyncadd [#allocation3], 4294966272 }
  0xa4   :  { %127 = vsyncpa [#allocation3], 1 }

</bundles_post_ra>
